<compile_context>
chip_gen: v7x
topology: tpu7x:2x2x1
jax: 0.10.0
libtpu: 0.0.40
codegen_flags: <defaults>
</compile_context>

<pallas_src>
import jax
import jax.numpy as jnp
from jax.experimental import pallas as pl
from jax.experimental.pallas import tpu as pltpu

_LANE = 128  # vreg lane width


def _mlp_kernel(x_ref, w1_ref, b1_ref, w2_ref, b2_ref, wh_ref, bh_ref, o_ref):
    # x tile cast once to bf16 (MXU native); weights arrive pre-cast to bf16 from the wrapper.
    # All matmuls accumulate in f32; bias-add / ReLU run in f32 on the VPU.
    x = x_ref[...].astype(jnp.bfloat16)

    # hidden layer 1: Linear + ReLU
    h = jnp.dot(x, w1_ref[...], preferred_element_type=jnp.float32) + b1_ref[...]
    h = jnp.maximum(h, 0.0)
    # hidden layer 2: Linear + ReLU
    h = jnp.dot(h.astype(jnp.bfloat16), w2_ref[...], preferred_element_type=jnp.float32) + b2_ref[...]
    h = jnp.maximum(h, 0.0)
    # head: Linear (no activation); output tile is lane-dense (last dim = multiple of 128)
    out = jnp.dot(h.astype(jnp.bfloat16), wh_ref[...], preferred_element_type=jnp.float32) + bh_ref[...]
    o_ref[...] = out.astype(o_ref.dtype)


def _pick_block_b(B):
    """Prefer a 128-512 batch tile with >= 2 grid steps; fall back to the full batch."""
    for cand in (512, 256, 128, 64, 32, 16, 8):
        if B >= 2 * cand and B % cand == 0:
            return cand
    return B


def mlp_forward(x, w1, b1, w2, b2, wh, bh, *, block_b=None):
    """x: (B, C_in); w1: (C_in, H1); w2: (H1, H2); wh: (H2, C_out); b*: (dim,)."""
    B, C_in = x.shape
    H1 = w1.shape[1]
    H2 = w2.shape[1]
    C_out = wh.shape[1]

    # --- lane-densify the head: pad output columns to a multiple of 128 (zeros) ---
    C_pad = max(_LANE, ((C_out + _LANE - 1) // _LANE) * _LANE)
    wh_p = jnp.zeros((H2, C_pad), wh.dtype).at[:, :C_out].set(wh)
    bh_p = jnp.zeros((C_pad,), bh.dtype).at[:C_out].set(bh)

    # --- one-time bf16 cast of the resident weights (MXU operands) ---
    w1_bf = w1.astype(jnp.bfloat16)
    w2_bf = w2.astype(jnp.bfloat16)
    wh_bf = wh_p.astype(jnp.bfloat16)

    # --- batch tiling: multiple grid steps when the batch allows it ---
    if block_b is None:
        block_b = _pick_block_b(B)
    assert block_b == B or block_b % 8 == 0, "batch tile must be a multiple of 8 (f32 sublane)"
    B_pad = ((B + block_b - 1) // block_b) * block_b
    x_p = x if B_pad == B else jnp.zeros((B_pad, C_in), x.dtype).at[:B, :].set(x)

    # biases as (1, dim) rows so they broadcast over the batch tile inside the kernel (f32)
    b1r = b1.reshape(1, H1)
    b2r = b2.reshape(1, H2)
    bhr = bh_p.reshape(1, C_pad)

    grid = (B_pad // block_b,)

    # --- advisory cost estimate for XLA scheduling around the custom call ---
    flops = 2 * B_pad * (C_in * H1 + H1 * H2 + H2 * C_pad)
    bytes_accessed = (
        4 * (B_pad * C_in + H1 + H2 + C_pad + B_pad * C_pad)      # f32: x, biases, out
        + 2 * (C_in * H1 + H1 * H2 + H2 * C_pad)                   # bf16 weights
    )
    cost = pl.CostEstimate(flops=flops, transcendentals=0, bytes_accessed=bytes_accessed)

    # --- explicit VMEM budget (double-buffered x/out tiles + resident weights), v7x-safe ---
    tile_bytes = 2 * 4 * (block_b * C_in + block_b * C_pad)         # 2x-buffered f32 in/out tiles
    weight_bytes = 2 * (2 * (C_in * H1 + H1 * H2 + H2 * C_pad)      # 2x-buffered bf16 weights
                        + 4 * (H1 + H2 + C_pad))                    # f32 bias rows
    vmem_limit = int(min(max(2 * (tile_bytes + weight_bytes), 4 << 20), 48 << 20))

    out_p = pl.pallas_call(
        _mlp_kernel,
        out_shape=jax.ShapeDtypeStruct((B_pad, C_pad), x.dtype),
        grid_spec=pltpu.PrefetchScalarGridSpec(
            num_scalar_prefetch=0,
            grid=grid,
            in_specs=[
                pl.BlockSpec((block_b, C_in), lambda i: (i, 0)),   # x tile over batch
                pl.BlockSpec((C_in, H1), lambda i: (0, 0)),        # w1 (full, resident, bf16)
                pl.BlockSpec((1, H1), lambda i: (0, 0)),           # b1 (f32)
                pl.BlockSpec((H1, H2), lambda i: (0, 0)),          # w2 (bf16)
                pl.BlockSpec((1, H2), lambda i: (0, 0)),           # b2 (f32)
                pl.BlockSpec((H2, C_pad), lambda i: (0, 0)),       # head weight (lane-padded, bf16)
                pl.BlockSpec((1, C_pad), lambda i: (0, 0)),        # head bias (lane-padded, f32)
            ],
            out_specs=pl.BlockSpec((block_b, C_pad), lambda i: (i, 0)),
        ),
        compiler_params=pltpu.CompilerParams(
            dimension_semantics=("parallel",),       # batch axis shards across TCs on v7x
            vmem_limit_bytes=vmem_limit,
        ),
        cost_estimate=cost,
    )(x_p, w1_bf, b1r, w2_bf, b2r, wh_bf, bhr)

    # strip batch padding and the zero-padded output lanes
    return out_p[:B, :C_out]


def mlp_reference(x, w1, b1, w2, b2, wh, bh):
    """Reference with the same bf16-operand / f32-accumulate numerics as the kernel."""
    def mm(a, w):
        return jnp.dot(a.astype(jnp.bfloat16), w.astype(jnp.bfloat16),
                       preferred_element_type=jnp.float32)
    h = jnp.maximum(mm(x, w1) + b1, 0.0)
    h = jnp.maximum(mm(h, w2) + b2, 0.0)
    return mm(h, wh) + bh


if __name__ == "__main__":
    # shapes consistent with the module: in_channels=16, hidden=[32, 32], out_channels=8
    # batch of 256 so the picked tile (128) gives a 2-step grid (pipelining / megacore).
    B, C_in, H1, H2, C_out = 256, 16, 32, 32, 8

    key = jax.random.PRNGKey(0)
    kx, k1, k2, k3, k4, k5, k6 = jax.random.split(key, 7)

    x = jax.random.normal(kx, (B, C_in), dtype=jnp.float32)

    # deterministic parameter init (Linear weights stored as (in, out))
    w1 = jax.random.normal(k1, (C_in, H1), dtype=jnp.float32) * (1.0 / jnp.sqrt(C_in))
    b1 = jax.random.normal(k2, (H1,), dtype=jnp.float32) * 0.01
    w2 = jax.random.normal(k3, (H1, H2), dtype=jnp.float32) * (1.0 / jnp.sqrt(H1))
    b2 = jax.random.normal(k4, (H2,), dtype=jnp.float32) * 0.01
    wh = jax.random.normal(k5, (H2, C_out), dtype=jnp.float32) * (1.0 / jnp.sqrt(H2))
    bh = jax.random.normal(k6, (C_out,), dtype=jnp.float32) * 0.01

    out = mlp_forward(x, w1, b1, w2, b2, wh, bh)
    out = jax.block_until_ready(out)

    ref = mlp_reference(x, w1, b1, w2, b2, wh, bh)
    assert out.shape == (B, C_out)
    assert jnp.allclose(out, ref, atol=2e-2, rtol=2e-2), "mismatch vs reference"

    print("KERNEL_OK")
</pallas_src>

<mosaic_0001>
module attributes {stable_mosaic.version = 11 : i64} {
  func.func @_mlp_kernel(%arg0: i32, %arg1: memref<128x16xf32, #tpu.memory_space<vmem>>, %arg2: memref<16x32xbf16, #tpu.memory_space<vmem>>, %arg3: memref<1x32xf32, #tpu.memory_space<vmem>>, %arg4: memref<32x32xbf16, #tpu.memory_space<vmem>>, %arg5: memref<1x32xf32, #tpu.memory_space<vmem>>, %arg6: memref<32x128xbf16, #tpu.memory_space<vmem>>, %arg7: memref<1x128xf32, #tpu.memory_space<vmem>>, %arg8: memref<128x128xf32, #tpu.memory_space<vmem>>) attributes {dimension_semantics = [#tpu.dimension_semantics<parallel>], iteration_bounds = array<i64: 2>, scalar_prefetch = 0 : i64, scratch_operands = 0 : i64, tpu.core_type = #tpu.core_type<tc>, window_params = [{transform_indices = @transform_0, window_bounds = array<i64: 128, 16>}, {pipeline_mode = #tpu.pipeline_mode<synchronous>, transform_indices = @transform_1, window_bounds = array<i64: 16, 32>}, {pipeline_mode = #tpu.pipeline_mode<synchronous>, transform_indices = @transform_2, window_bounds = array<i64: 1, 32>}, {pipeline_mode = #tpu.pipeline_mode<synchronous>, transform_indices = @transform_3, window_bounds = array<i64: 32, 32>}, {pipeline_mode = #tpu.pipeline_mode<synchronous>, transform_indices = @transform_4, window_bounds = array<i64: 1, 32>}, {pipeline_mode = #tpu.pipeline_mode<synchronous>, transform_indices = @transform_5, window_bounds = array<i64: 32, 128>}, {pipeline_mode = #tpu.pipeline_mode<synchronous>, transform_indices = @transform_6, window_bounds = array<i64: 1, 128>}, {transform_indices = @transform_7, window_bounds = array<i64: 128, 128>}]} {
    %c0 = arith.constant 0 : index
    %c0_0 = arith.constant 0 : index
    %0 = vector.load %arg1[%c0, %c0_0] : memref<128x16xf32, #tpu.memory_space<vmem>>, vector<128x16xf32>
    %1 = arith.truncf %0 : vector<128x16xf32> to vector<128x16xbf16>
    %c0_1 = arith.constant 0 : index
    %c0_2 = arith.constant 0 : index
    %2 = vector.load %arg2[%c0_1, %c0_2] : memref<16x32xbf16, #tpu.memory_space<vmem>>, vector<16x32xbf16>
    %cst = arith.constant dense<0.000000e+00> : vector<128x32xf32>
    %3 = tpu.matmul %1, %2, %cst {dimension_numbers = #tpu.dot_dimension_numbers<[1], [0], [0], [1], [0, 0, 1, 1], [], []>} : vector<128x16xbf16>, vector<16x32xbf16>, vector<128x32xf32> -> vector<128x32xf32>
    %c0_3 = arith.constant 0 : index
    %c0_4 = arith.constant 0 : index
    %4 = vector.load %arg3[%c0_3, %c0_4] : memref<1x32xf32, #tpu.memory_space<vmem>>, vector<1x32xf32>
    %5 = vector.broadcast %4 : vector<1x32xf32> to vector<128x32xf32>
    %6 = arith.addf %3, %5 : vector<128x32xf32>
    %cst_5 = arith.constant 0.000000e+00 : f32
    %7 = vector.broadcast %cst_5 : f32 to vector<128x32xf32>
    %8 = arith.maximumf %6, %7 : vector<128x32xf32>
    %9 = arith.truncf %8 : vector<128x32xf32> to vector<128x32xbf16>
    %c0_6 = arith.constant 0 : index
    %c0_7 = arith.constant 0 : index
    %10 = vector.load %arg4[%c0_6, %c0_7] : memref<32x32xbf16, #tpu.memory_space<vmem>>, vector<32x32xbf16>
    %cst_8 = arith.constant dense<0.000000e+00> : vector<128x32xf32>
    %11 = tpu.matmul %9, %10, %cst_8 {dimension_numbers = #tpu.dot_dimension_numbers<[1], [0], [0], [1], [0, 0, 1, 1], [], []>} : vector<128x32xbf16>, vector<32x32xbf16>, vector<128x32xf32> -> vector<128x32xf32>
    %c0_9 = arith.constant 0 : index
    %c0_10 = arith.constant 0 : index
    %12 = vector.load %arg5[%c0_9, %c0_10] : memref<1x32xf32, #tpu.memory_space<vmem>>, vector<1x32xf32>
    %13 = vector.broadcast %12 : vector<1x32xf32> to vector<128x32xf32>
    %14 = arith.addf %11, %13 : vector<128x32xf32>
    %cst_11 = arith.constant 0.000000e+00 : f32
    %15 = vector.broadcast %cst_11 : f32 to vector<128x32xf32>
    %16 = arith.maximumf %14, %15 : vector<128x32xf32>
    %17 = arith.truncf %16 : vector<128x32xf32> to vector<128x32xbf16>
    %c0_12 = arith.constant 0 : index
    %c0_13 = arith.constant 0 : index
    %18 = vector.load %arg6[%c0_12, %c0_13] : memref<32x128xbf16, #tpu.memory_space<vmem>>, vector<32x128xbf16>
    %cst_14 = arith.constant dense<0.000000e+00> : vector<128x128xf32>
    %19 = tpu.matmul %17, %18, %cst_14 {dimension_numbers = #tpu.dot_dimension_numbers<[1], [0], [0], [1], [0, 0, 1, 1], [], []>} : vector<128x32xbf16>, vector<32x128xbf16>, vector<128x128xf32> -> vector<128x128xf32>
    %c0_15 = arith.constant 0 : index
    %c0_16 = arith.constant 0 : index
    %20 = vector.load %arg7[%c0_15, %c0_16] : memref<1x128xf32, #tpu.memory_space<vmem>>, vector<1x128xf32>
    %21 = vector.broadcast %20 : vector<1x128xf32> to vector<128x128xf32>
    %22 = arith.addf %19, %21 : vector<128x128xf32>
    %c0_17 = arith.constant 0 : index
    %c0_18 = arith.constant 0 : index
    %23 = vector.load %arg8[%c0_17, %c0_18] : memref<128x128xf32, #tpu.memory_space<vmem>>, vector<128x128xf32>
    tpu.vector_store %arg8[%c0_17, %c0_18], %22 {strides = array<i32>} : memref<128x128xf32, #tpu.memory_space<vmem>>, vector<128x128xf32>,
    return
  }
  func.func @transform_0(%arg0: i32) -> (i32, i32) {
    %c0_i32 = arith.constant 0 : i32
    %c0_i32_0 = arith.constant 0 : i32
    return %arg0, %c0_i32 : i32, i32
  }
  func.func @transform_1(%arg0: i32) -> (i32, i32) {
    %c0_i32 = arith.constant 0 : i32
    %c0_i32_0 = arith.constant 0 : i32
    %c0_i32_1 = arith.constant 0 : i32
    return %c0_i32, %c0_i32_0 : i32, i32
  }
  func.func @transform_2(%arg0: i32) -> (i32, i32) {
    %c0_i32 = arith.constant 0 : i32
    %c0_i32_0 = arith.constant 0 : i32
    %c0_i32_1 = arith.constant 0 : i32
    return %c0_i32, %c0_i32_0 : i32, i32
  }
  func.func @transform_3(%arg0: i32) -> (i32, i32) {
    %c0_i32 = arith.constant 0 : i32
    %c0_i32_0 = arith.constant 0 : i32
    %c0_i32_1 = arith.constant 0 : i32
    return %c0_i32, %c0_i32_0 : i32, i32
  }
  func.func @transform_4(%arg0: i32) -> (i32, i32) {
    %c0_i32 = arith.constant 0 : i32
    %c0_i32_0 = arith.constant 0 : i32
    %c0_i32_1 = arith.constant 0 : i32
    return %c0_i32, %c0_i32_0 : i32, i32
  }
  func.func @transform_5(%arg0: i32) -> (i32, i32) {
    %c0_i32 = arith.constant 0 : i32
    %c0_i32_0 = arith.constant 0 : i32
    %c0_i32_1 = arith.constant 0 : i32
    return %c0_i32, %c0_i32_0 : i32, i32
  }
  func.func @transform_6(%arg0: i32) -> (i32, i32) {
    %c0_i32 = arith.constant 0 : i32
    %c0_i32_0 = arith.constant 0 : i32
    %c0_i32_1 = arith.constant 0 : i32
    return %c0_i32, %c0_i32_0 : i32, i32
  }
  func.func @transform_7(%arg0: i32) -> (i32, i32) {
    %c0_i32 = arith.constant 0 : i32
    %c0_i32_0 = arith.constant 0 : i32
    return %arg0, %c0_i32 : i32, i32
  }
}

</mosaic_0001>

<bundles_post_ra>
// kernel: tpu_custom_call.1
= control target key start
LH: loop header
LB: loop body
LE: loop exit
PB: predicated region body
PF: predicated region fallthrough
CT: control target
= control target key end

     0   :  { %12 = vsyncpa [#allocation3], 0  ;;  %s1331_s0 = inlined_call_operand.vmem [shape: f32[256,16], index: 0, kind: input, shape index: {}]   ;;  %s1332_s1 = inlined_call_operand.vmem [shape: bf16[16,32], index: 1, kind: input, shape index: {}]   ;;  %s1333_s2 = inlined_call_operand.vmem [shape: f32[1,32], index: 2, kind: input, shape index: {}]   ;;  %s1334_s3 = inlined_call_operand.vmem [shape: bf16[32,32], index: 3, kind: input, shape index: {}]   ;;  %s1335_s4 = inlined_call_operand.vmem [shape: f32[1,32], index: 4, kind: input, shape index: {}]   ;;  %s1336_s5 = inlined_call_operand.vmem [shape: bf16[32,128], index: 5, kind: input, shape index: {}]   ;;  %s1337_s6 = inlined_call_operand.vmem [shape: f32[1,128], index: 6, kind: input, shape index: {}]   ;;  %s1338_s7 = inlined_call_operand.hbm [shape: f32[256,128], index: 7, kind: output, shape index: {}]  }
   0x1   :  { %14 = vsyncpa [#allocation3 + $0x1], 0  ;;  %s1158_s24 = smov 0   ;;  %s1160_s25 = smov 0  }
   0x2   :  { %s1162_s26 = smov 0   ;;  %s1164_s27 = smov 0  }
   0x3 LB: > { %s1179_s28 = sadd.s32 4294967295, %s1113_s27   ;;  %s871_s29 = sadd.s32 4294967294, %s1113_s27   ;;  %s1113_s27 = sphi %s1164_s27, %s1344_s27   ;;  %s1109_s26 = sphi %s1162_s26, %s1343_s26   ;;  %s1105_s25 = sphi %s1160_s25, %s1342_s25   ;;  %s1101_s24 = sphi %s1158_s24, %s1341_s24  }
   0x4   : > { %s1183_s30 = sadd.s32 1, %s1113_s27   ;;  %s179_s8 = sadd.s32 1, %s1109_s26 }
   0x5   : > { %s176_s9 = ssub.s32 %s1113_s27, %s1183_s30  ;;  %p189_p0 = scmp.ne.s32.totalorder %s1109_s26, %s1105_s25 }
   0x6   : > { %p177_p1 = scmp.eq.s32.totalorder %s176_s9, 0  ;;  %p190_p2 = scmp.eq.s32.totalorder %s1179_s28, 1 }
   0x7   : > { %p195_p3 = scmp.ne.s32.totalorder %s1105_s25, %s1101_s24  ;;  %p196_p4 = scmp.eq.s32.totalorder %s871_s29, 1 }
   0x8   : > { %s1194_s10 = scalar_select %p177_p1, %s1109_s26, %s179_s8  }
   0x9   : > { %p1196_p5 = por %p190_p2, %p189_p0  ;;  %p1200_p6 = por %p196_p4, %p195_p3 }
   0xa   : > { %p874_p7 = scmp.ge.s32.totalorder %s1113_s27, 1  ;;  %p241_p8 = scmp.lt.s32.totalorder %s1113_s27, 3 }
   0xc   : > { %p242_p9 = pnand %p874_p7, %p241_p8 }
   0xd   : > { %v1046_v0 = vld [vmem:[%s1332_s1] sm:$0xff] (!%p242_p9)   ;;  %s876_s15 = sshll.u32 (!%p242_p9), %s1179_s28, 4  ;;  %vm320_vm0 = vcmask (!%p242_p9), 130048   ;;  %v1048_v26 = vld [vmem:[%s1334_s3 + $0x8] sm:$0xff] (!%p242_p9)   ;;  %vm489_vm1 = vcmask (!%p242_p9), 261120   ;;  %s915_s23 = sshll.u32 (!%p242_p9), %s1179_s28, 11 }
   0xe   : > { %245 = sbr.rel (%p242_p9) target bundleno = 728 (0x2d8), region = 48  ;;  %p274_p10 = scmp.lt.s32.totalorder (!%p242_p9), %s876_s15, 31  ;;  %945 = vmatprep.subr.bf16.mxu0 (!%p242_p9), %v1046_v0  ;;  %1003 = vmatprep.subr.bf16.mxu1 (!%p242_p9), %v1046_v0  ;;  %v1047_v1 = vld [vmem:[%s1334_s3] sm:$0xff] (!%p242_p9)  }
   0xf   : > { %946 = vmatpush3.bf16.msra.mxu0 (!%p242_p9), %v1046_v0  ;;  %1004 = vmatpush3.bf16.msra.mxu1 (!%p242_p9), %v1046_v0  ;;  %v1049_v27 = vld [vmem:[%s1336_s5] sm:$0xff] (!%p242_p9)   ;;  %s1281_s13 = scalar_lea.hbm (!%p242_p9), %s1338_s7, %s915_s23 }
  0x10   : > { %963 = vmatprep.subr.bf16.mxu1 (!%p242_p9), %v1047_v1  ;;  %983 = vmatprep.subr.bf16.mxu0 (!%p242_p9), %v1049_v27  ;;  %v878_v28 = vld [vmem:[%s1333_s2] ss:$0 sm:$0xff] (!%p242_p9) }
  0x15   : > { %s1346_s15 = smov (!%p274_p10, %s876_s15), 31 }
  0x16   : > { %s877_s18 = sshll.u32 %s1346_s15, 3  ;;  %s1115_s15 = smov [#allocation2]  }
  0x17   : > { %s277_s21 = scalar_lea.vmem %s1331_s0, %s877_s18  ;;  %s270_s18 = sand.u32 1, %s1105_s25  }
  0x18   : > { %v281_v2 = vld [vmem:[%s277_s21] sm:$0xff]  ;;  %v282_v3 = vld [vmem:[%s277_s21 + $0x8] sm:$0xff]  ;;  %v283_v4 = vld [vmem:[%s277_s21 + $0x10] sm:$0xff]  ;;  %s875_s19 = sshll.u32 %s270_s18, 7  ;;  %s1290_s28 = scalar_lea.sflag [#allocation3], %s270_s18 }
  0x19   : > { %v297_v5 = vpack.c.bf16 %v282_v3, %v281_v2  ;;  %v284_v6 = vld [vmem:[%s277_s21 + $0x18] sm:$0xff]  ;;  %v285_v7 = vld [vmem:[%s277_s21 + $0x20] sm:$0xff]  ;;  %v286_v8 = vld [vmem:[%s277_s21 + $0x28] sm:$0xff]  ;;  %s1261_s22 = scalar_lea.vmem [#allocation2], %s875_s19  ;;  %s1055_s16 = sshll.u32 %s1115_s15, 4  ;;  %s1056_s16 = int_to_ptr.vmem [resolvable:$false] %s1055_s16 }
  0x1a   : > { %v298_v9 = vpack.c.bf16 %v284_v6, %v283_v4  ;;  %v299_v10 = vpack.c.bf16 %v286_v8, %v285_v7  ;;  %v289_v11 = vld [vmem:[%s277_s21 + $0x40] sm:$0xff]  ;;  %v290_v12 = vld [vmem:[%s277_s21 + $0x48] sm:$0xff]  ;;  %v291_v13 = vld [vmem:[%s277_s21 + $0x50] sm:$0xff]  ;;  %s809_s29 = sshll.u32 %s1261_s22, 4  ;;  %s1057_s17 = scalar_lea.vmem %s1056_s16, 4096  ;;  %s1283_s29 = int_to_ptr.vmem [resolvable:$true] %s809_s29 }
  0x1b   : > { %947 = vmatprep.mubr.msk.bf16.mxu0 %vm320_vm0, %v297_v5  ;;  %v292_v14 = vld [vmem:[%s277_s21 + $0x58] sm:$0xff]  ;;  %v301_v15 = vpack.c.bf16 %v290_v12, %v289_v11  ;;  %v293_v17 = vld [vmem:[%s277_s21 + $0x60] sm:$0xff]  ;;  %v294_v18 = vld [vmem:[%s277_s21 + $0x68] sm:$0xff]  ;;  %s1051_s14 = scalar_lea.vmem %s1283_s29, 2048  ;;  %p1058_p0 = scmp.lt.s32.totalorder %s1283_s29, %s1056_s16 }
  0x1c   : > { %948 = vmatmul.mubr.msk.bf16.vlgmr.msra.gmra.mrb[0].mxu0 %vm320_vm0, %v298_v9  ;;  %v302_v16 = vpack.c.bf16 %v292_v14, %v291_v13  ;;  %v287_v19 = vld [vmem:[%s277_s21 + $0x30] sm:$0xff]  ;;  %v288_v20 = vld [vmem:[%s277_s21 + $0x38] sm:$0xff]  ;;  %v303_v21 = vpack.c.bf16 %v294_v18, %v293_v17  ;;  %p1052_p11 = scmp.ne.s32.totalorder %s1283_s29, %s1051_s14  ;;  %p1059_p1 = scmp.lt.s32.totalorder %s1057_s17, %s1051_s14 }
  0x1d   : > { %951 = vmatprep.mubr.msk.bf16.mxu0 %vm320_vm0, %v299_v10  ;;  %955 = vmatprep.mubr.msk.bf16.mxu1 %vm320_vm0, %v301_v15  ;;  %v300_v22 = vpack.c.bf16 %v288_v20, %v287_v19  ;;  %v295_v23 = vld [vmem:[%s277_s21 + $0x70] sm:$0xff]  ;;  %v296_v24 = vld [vmem:[%s277_s21 + $0x78] sm:$0xff] }
  0x1e   : > { %956 = vmatmul.mubr.msk.bf16.vlgmr.msra.gmra.mrb[0].mxu1 %vm320_vm0, %v302_v16  ;;  %v304_v25 = vpack.c.bf16 %v296_v24, %v295_v23  ;;  %984 = vmatpush3.bf16.msra.mxu0 %v1049_v27  ;;  %p1053_p12 = pnand %p1052_p11, %p1196_p5  ;;  %p1060_p2 = por %p1059_p1, %p1058_p0 }
  0x1f   : > { %959 = vmatprep.mubr.msk.bf16.mxu1 %vm320_vm0, %v303_v21  ;;  %964 = vmatpush3.bf16.msra.mxu1 %v1047_v1  ;;  %v1050_v21 = vld [vmem:[%s1336_s5 + $0x8] sm:$0xff]  }
  0x20   : > { %965 = vmatprep.subr.bf16.mxu1 %v1048_v26  ;;  %985 = vmatprep.subr.bf16.mxu0 %v1050_v21  ;;  %p1054_p13 = pneg %p1053_p12 }
  0x22   : > { %986 = vmatpush3.bf16.msra.mxu0 %v1050_v21  ;;  %p1061_p3 = pnand %p1060_p2, %p1054_p13 }
  0x23   : > { %966 = vmatpush3.bf16.msra.mxu1 %v1048_v26 }
  0x24   : > { %952 = vmatmul.mubr.msk.bf16.gmra.mrb[4].mxu0 %vm320_vm0, %v300_v22  ;;  %v888_v22 = vld [vmem:[%s1335_s4] ss:$0 sm:$0xff] }
  0x26   : > { %960 = vmatmul.mubr.msk.bf16.gmra.mrb[4].mxu1 %vm320_vm0, %v304_v25 }
  0xef   : > { %v949_v29 = vpop.f32.mrb[0].mxu0 }
  0xf0   : > { %v388_v30 = vadd.f32 %v949_v29, %v878_v28  ;;  %v379_v31 = vpop.f32.mrb[1].mxu0 }
  0xf1   : > { %v380_v32 = vadd.f32 %v878_v28, %v379_v31  ;;  %v950_v33 = vpop.f32.mrb[2].mxu0  ;;  %v957_v36 = vpop.f32.mrb[0].mxu1 }
  0xf2   : > { %v391_v34 = vadd.f32 %v950_v33, %v878_v28  ;;  %v382_v35 = vpop.f32.mrb[3].mxu0  ;;  %v420_v38 = vadd.f32 %v957_v36, %v878_v28  ;;  %v411_v39 = vpop.f32.mrb[1].mxu1  ;;  %v444_v40 = vmax.f32 %v388_v30, 0.0 }
  0xf3   : > { %v383_v37 = vadd.f32 %v878_v28, %v382_v35  ;;  %v412_v42 = vadd.f32 %v878_v28, %v411_v39  ;;  %v958_v43 = vpop.f32.mrb[2].mxu1  ;;  %v442_v44 = vmax.f32 %v380_v32, 0.0 }
  0xf4   : > { %v445_v41 = vmax.f32 %v391_v34, 0.0  ;;  %v452_v46 = vmax.f32 %v420_v38, 0.0  ;;  %v423_v47 = vadd.f32 %v958_v43, %v878_v28  ;;  %v414_v48 = vpop.f32.mrb[3].mxu1 }
  0xf5   : > { %v443_v45 = vmax.f32 %v383_v37, 0.0  ;;  %v450_v50 = vmax.f32 %v412_v42, 0.0  ;;  %v415_v51 = vadd.f32 %v878_v28, %v414_v48 }
  0xf6   : > { %v459_v49 = vpack.c.bf16 %v445_v41, %v444_v40  ;;  %v453_v54 = vmax.f32 %v423_v47, 0.0 }
  0xf7   : > { %v458_v52 = vpack.c.bf16 %v443_v45, %v442_v44  ;;  %v953_v53 = vpop.f32.mrb[4].mxu0  ;;  %v451_v57 = vmax.f32 %v415_v51, 0.0 }
  0xf8   : > { %v404_v55 = vadd.f32 %v953_v53, %v878_v28  ;;  %v395_v56 = vpop.f32.mrb[5].mxu0  ;;  %v463_v60 = vpack.c.bf16 %v453_v54, %v452_v46 }
  0xf9   : > { %v396_v58 = vadd.f32 %v878_v28, %v395_v56  ;;  %v954_v59 = vpop.f32.mrb[6].mxu0  ;;  %967 = vmatprep.mubr.msk.bf16.mxu1 %vm489_vm1, %v458_v52  ;;  %v462_v63 = vpack.c.bf16 %v451_v57, %v450_v50  ;;  %v961_v0 = vpop.f32.mrb[4].mxu1 }
  0xfa   : > { %v407_v61 = vadd.f32 %v954_v59, %v878_v28  ;;  %v398_v62 = vpop.f32.mrb[7].mxu0  ;;  %968 = vmatmul.mubr.msk.bf16.vlgmr.msra.gmra.mrb[8].mxu1 %vm489_vm1, %v459_v49  ;;  %v436_v2 = vadd.f32 %v961_v0, %v878_v28  ;;  %v427_v3 = vpop.f32.mrb[5].mxu1  ;;  %v448_v4 = vmax.f32 %v404_v55, 0.0 }
  0xfb   : > { %v399_v1 = vadd.f32 %v878_v28, %v398_v62  ;;  %v428_v6 = vadd.f32 %v878_v28, %v427_v3  ;;  %v962_v7 = vpop.f32.mrb[6].mxu1  ;;  %v446_v8 = vmax.f32 %v396_v58, 0.0 }
  0xfc   : > { %v449_v5 = vmax.f32 %v407_v61, 0.0  ;;  %v456_v10 = vmax.f32 %v436_v2, 0.0  ;;  %v439_v11 = vadd.f32 %v962_v7, %v878_v28  ;;  %v430_v12 = vpop.f32.mrb[7].mxu1 }
  0xfd   : > { %v447_v9 = vmax.f32 %v399_v1, 0.0  ;;  %v454_v14 = vmax.f32 %v428_v6, 0.0  ;;  %v431_v15 = vadd.f32 %v878_v28, %v430_v12 }
  0xfe   : > { %v461_v13 = vpack.c.bf16 %v449_v5, %v448_v4  ;;  %v457_v17 = vmax.f32 %v439_v11, 0.0 }
  0xff   : > { %v460_v16 = vpack.c.bf16 %v447_v9, %v446_v8  ;;  %v455_v18 = vmax.f32 %v431_v15, 0.0  ;;  %v899_v15 = vld [vmem:[%s1337_s6] ss:$0 sm:$0xff] }
 0x100   : > { %v465_v19 = vpack.c.bf16 %v457_v17, %v456_v10 }
 0x101   : > { %971 = vmatprep.mubr.msk.bf16.mxu1 %vm489_vm1, %v460_v16  ;;  %v464_v20 = vpack.c.bf16 %v455_v18, %v454_v14 }
 0x102   : > { %972 = vmatmul.mubr.msk.bf16.gmra.mrb[12].mxu1 %vm489_vm1, %v461_v13 }
 0x103   : > { %975 = vmatprep.mubr.msk.bf16.mxu1 %vm489_vm1, %v462_v63 }
 0x10a   : > { %976 = vmatmul.mubr.msk.bf16.gmra.mrb[16].mxu1 %vm489_vm1, %v463_v60 }
 0x10b   : > { %979 = vmatprep.mubr.msk.bf16.mxu1 %vm489_vm1, %v464_v20 }
 0x112   : > { %980 = vmatmul.mubr.msk.bf16.gmra.mrb[20].mxu1 %vm489_vm1, %v465_v19 }
 0x1cd   : > { %v969_v23 = vpop.f32.mrb[8].mxu1 }
 0x1ce   : > { %v557_v24 = vadd.f32 %v969_v23, %v888_v22  ;;  %v548_v25 = vpop.f32.mrb[9].mxu1 }
 0x1cf   : > { %v549_v26 = vadd.f32 %v888_v22, %v548_v25  ;;  %v970_v27 = vpop.f32.mrb[10].mxu1 }
 0x1d0   : > { %v560_v28 = vadd.f32 %v970_v27, %v888_v22  ;;  %v551_v29 = vpop.f32.mrb[11].mxu1  ;;  %v613_v31 = vmax.f32 %v557_v24, 0.0 }
 0x1d1   : > { %v552_v30 = vadd.f32 %v888_v22, %v551_v29  ;;  %v611_v33 = vmax.f32 %v549_v26, 0.0 }
 0x1d2   : > { %v614_v32 = vmax.f32 %v560_v28, 0.0 }
 0x1d3   : > { %v612_v34 = vmax.f32 %v552_v30, 0.0 }
 0x1d4   : > { %v628_v35 = vpack.c.bf16 %v614_v32, %v613_v31 }
 0x1d5   : > { %v627_v36 = vpack.c.bf16 %v612_v34, %v611_v33  ;;  %v973_v37 = vpop.f32.mrb[12].mxu1 }
 0x1d6   : > { %v573_v38 = vadd.f32 %v973_v37, %v888_v22  ;;  %v564_v39 = vpop.f32.mrb[13].mxu1 }
 0x1d7   : > { %v565_v40 = vadd.f32 %v888_v22, %v564_v39  ;;  %v974_v41 = vpop.f32.mrb[14].mxu1  ;;  %987 = vmatprep.mubr.msk.bf16.mxu0 %vm489_vm1, %v627_v36 }
 0x1d8   : > { %v576_v42 = vadd.f32 %v974_v41, %v888_v22  ;;  %v567_v43 = vpop.f32.mrb[15].mxu1  ;;  %988 = vmatmul.mubr.msk.bf16.vlgmr.msra.gmra.mrb[8].mxu0 %vm489_vm1, %v628_v35  ;;  %v617_v45 = vmax.f32 %v573_v38, 0.0 }
 0x1d9   : > { %v568_v44 = vadd.f32 %v888_v22, %v567_v43  ;;  %v615_v47 = vmax.f32 %v565_v40, 0.0 }
 0x1da   : > { %v618_v46 = vmax.f32 %v576_v42, 0.0 }
 0x1db   : > { %v616_v48 = vmax.f32 %v568_v44, 0.0 }
 0x1dc   : > { %v630_v49 = vpack.c.bf16 %v618_v46, %v617_v45 }
 0x1dd   : > { %v629_v50 = vpack.c.bf16 %v616_v48, %v615_v47  ;;  %v977_v51 = vpop.f32.mrb[16].mxu1 }
 0x1de   : > { %v589_v52 = vadd.f32 %v977_v51, %v888_v22  ;;  %v580_v53 = vpop.f32.mrb[17].mxu1 }
 0x1df   : > { %v581_v54 = vadd.f32 %v888_v22, %v580_v53  ;;  %v978_v55 = vpop.f32.mrb[18].mxu1  ;;  %991 = vmatprep.mubr.msk.bf16.mxu0 %vm489_vm1, %v629_v50 }
 0x1e0   : > { %v592_v56 = vadd.f32 %v978_v55, %v888_v22  ;;  %v583_v57 = vpop.f32.mrb[19].mxu1  ;;  %992 = vmatmul.mubr.msk.bf16.gmra.mrb[12].mxu0 %vm489_vm1, %v630_v49  ;;  %v621_v59 = vmax.f32 %v589_v52, 0.0 }
 0x1e1   : > { %v584_v58 = vadd.f32 %v888_v22, %v583_v57  ;;  %v619_v61 = vmax.f32 %v581_v54, 0.0 }
 0x1e2   : > { %v622_v60 = vmax.f32 %v592_v56, 0.0 }
 0x1e3   : > { %v620_v62 = vmax.f32 %v584_v58, 0.0 }
 0x1e4   : > { %v632_v63 = vpack.c.bf16 %v622_v60, %v621_v59 }
 0x1e5   : > { %v631_v0 = vpack.c.bf16 %v620_v62, %v619_v61  ;;  %v981_v1 = vpop.f32.mrb[20].mxu1 }
 0x1e6   : > { %v605_v2 = vadd.f32 %v981_v1, %v888_v22  ;;  %v596_v3 = vpop.f32.mrb[21].mxu1 }
 0x1e7   : > { %v597_v4 = vadd.f32 %v888_v22, %v596_v3  ;;  %v982_v5 = vpop.f32.mrb[22].mxu1  ;;  %995 = vmatprep.mubr.msk.bf16.mxu0 %vm489_vm1, %v631_v0 }
 0x1e8   : > { %v608_v6 = vadd.f32 %v982_v5, %v888_v22  ;;  %v599_v7 = vpop.f32.mrb[23].mxu1  ;;  %996 = vmatmul.mubr.msk.bf16.gmra.mrb[16].mxu0 %vm489_vm1, %v632_v63  ;;  %v625_v9 = vmax.f32 %v605_v2, 0.0 }
 0x1e9   : > { %v600_v8 = vadd.f32 %v888_v22, %v599_v7  ;;  %v623_v11 = vmax.f32 %v597_v4, 0.0 }
 0x1ea   : > { %v626_v10 = vmax.f32 %v608_v6, 0.0 }
 0x1eb   : > { %v624_v12 = vmax.f32 %v600_v8, 0.0 }
 0x1ec   : > { %v634_v13 = vpack.c.bf16 %v626_v10, %v625_v9 }
 0x1ed   : > { %v633_v14 = vpack.c.bf16 %v624_v12, %v623_v11 }
 0x1ef   : > { %999 = vmatprep.mubr.msk.bf16.mxu0 %vm489_vm1, %v633_v14 }
 0x1f0   : > { %1000 = vmatmul.mubr.msk.bf16.gmra.mrb[20].mxu0 %vm489_vm1, %v634_v13 }
 0x2ab   : > { %v989_v16 = vpop.f32.mrb[8].mxu0 }
 0x2ac   : > { %v725_v17 = vadd.f32 %v989_v16, %v899_v15  ;;  %v716_v18 = vpop.f32.mrb[9].mxu0 }
 0x2ad   : > { %v717_v19 = vadd.f32 %v899_v15, %v716_v18  ;;  %v990_v20 = vpop.f32.mrb[10].mxu0 }
 0x2ae   : > { %781 = vst [vmem:[%s1261_s22 + $0x10] sm:$0xff] %v725_v17  ;;  %v728_v21 = vadd.f32 %v990_v20, %v899_v15  ;;  %v719_v22 = vpop.f32.mrb[11].mxu0 }
 0x2af   : > { %779 = vst [vmem:[%s1261_s22] sm:$0xff] %v717_v19  ;;  %v720_v23 = vadd.f32 %v899_v15, %v719_v22 }
 0x2b0   : > { %782 = vst [vmem:[%s1261_s22 + $0x18] sm:$0xff] %v728_v21 }
 0x2b1   : > { %780 = vst [vmem:[%s1261_s22 + $0x8] sm:$0xff] %v720_v23 }
 0x2b3   : > { %v993_v24 = vpop.f32.mrb[12].mxu0 }
 0x2b4   : > { %v741_v25 = vadd.f32 %v993_v24, %v899_v15  ;;  %v732_v26 = vpop.f32.mrb[13].mxu0 }
 0x2b5   : > { %v733_v27 = vadd.f32 %v899_v15, %v732_v26  ;;  %v994_v28 = vpop.f32.mrb[14].mxu0 }
 0x2b6   : > { %785 = vst [vmem:[%s1261_s22 + $0x30] sm:$0xff] %v741_v25  ;;  %v744_v29 = vadd.f32 %v994_v28, %v899_v15  ;;  %v735_v30 = vpop.f32.mrb[15].mxu0 }
 0x2b7   : > { %783 = vst [vmem:[%s1261_s22 + $0x20] sm:$0xff] %v733_v27  ;;  %v736_v31 = vadd.f32 %v899_v15, %v735_v30 }
 0x2b8   : > { %786 = vst [vmem:[%s1261_s22 + $0x38] sm:$0xff] %v744_v29 }
 0x2b9   : > { %784 = vst [vmem:[%s1261_s22 + $0x28] sm:$0xff] %v736_v31 }
 0x2bb   : > { %v997_v32 = vpop.f32.mrb[16].mxu0 }
 0x2bc   : > { %v757_v33 = vadd.f32 %v997_v32, %v899_v15  ;;  %v748_v34 = vpop.f32.mrb[17].mxu0 }
 0x2bd   : > { %v749_v35 = vadd.f32 %v899_v15, %v748_v34  ;;  %v998_v36 = vpop.f32.mrb[18].mxu0 }
 0x2be   : > { %789 = vst [vmem:[%s1261_s22 + $0x50] sm:$0xff] %v757_v33  ;;  %v760_v37 = vadd.f32 %v998_v36, %v899_v15  ;;  %v751_v38 = vpop.f32.mrb[19].mxu0 }
 0x2bf   : > { %787 = vst [vmem:[%s1261_s22 + $0x40] sm:$0xff] %v749_v35  ;;  %v752_v39 = vadd.f32 %v899_v15, %v751_v38 }
 0x2c0   : > { %790 = vst [vmem:[%s1261_s22 + $0x58] sm:$0xff] %v760_v37 }
 0x2c1   : > { %788 = vst [vmem:[%s1261_s22 + $0x48] sm:$0xff] %v752_v39 }
 0x2c3   : > { %v1001_v40 = vpop.f32.mrb[20].mxu0 }
 0x2c4   : > { %v773_v41 = vadd.f32 %v1001_v40, %v899_v15  ;;  %v764_v42 = vpop.f32.mrb[21].mxu0 }
 0x2c5   : > { %v765_v43 = vadd.f32 %v899_v15, %v764_v42  ;;  %v1002_v44 = vpop.f32.mrb[22].mxu0 }
 0x2c6   : > { %793 = vst [vmem:[%s1261_s22 + $0x70] sm:$0xff] %v773_v41  ;;  %v776_v45 = vadd.f32 %v1002_v44, %v899_v15  ;;  %v767_v46 = vpop.f32.mrb[23].mxu0 }
 0x2c7   : > { %791 = vst [vmem:[%s1261_s22 + $0x60] sm:$0xff] %v765_v43  ;;  %v768_v47 = vadd.f32 %v899_v15, %v767_v46 }
 0x2c8   : > { %794 = vst [vmem:[%s1261_s22 + $0x78] sm:$0xff] %v776_v45 }
 0x2c9   : > { %792 = vst [vmem:[%s1261_s22 + $0x68] sm:$0xff] %v768_v47 }
 0x2ca   : > { %1064 = shalt.err (!%p1061_p3)
}
 0x2cb   : > { %s1065_s18 = scalar_lea.hbm %s1281_s13, 2048  ;;  %s1069_s21 = scalar_lea.hbm %s1338_s7, 4096 }
 0x2cc   : > { %p1066_p4 = scmp.ne.s32.totalorder %s1281_s13, %s1065_s18  ;;  %p1070_p9 = scmp.lt.u32.totalorder %s1281_s13, %s1338_s7 }
 0x2cd   : > { %p1071_p10 = scmp.lt.u32.totalorder %s1069_s21, %s1065_s18  ;;  %p1073_p12 = scmp.lt.u32.totalorder %s1065_s18, %s1281_s13 }
 0x2ce   : > { %p1067_p7 = pnand %p1066_p4, %p1196_p5 }
 0x2cf   : > { %p1072_p11 = por %p1071_p10, %p1070_p9 }
 0x2d0   : > { %p1068_p8 = pneg %p1067_p7 }
 0x2d1   : > { %p1074_p13 = por %p1073_p12, %p1072_p11 }
 0x2d3   : > { %p1075_p0 = pnand %p1074_p13, %p1068_p8 }
 0x2d5   : > { %1078 = shalt.err (!%p1075_p0)
}
 0x2d6   : > { %s1116_s8 = smov 128   ;;  %s1117_s9 = smov 8  }
 0x2d7   : > { %1005 = dma.vmem_to_hbm [thread:$0]  (%p1196_p5), %s1283_s29, 2048, %s1281_s13, %s1290_s28, %s1116_s8, %s1116_s8, %s1117_s9  }
 0x2d8 PF: > { %p1011_p1 = scmp.ge.s32.totalorder %s1113_s27, 2  ;;  %s824_s14 = sand.u32 1, %s1101_s24  }
 0x2d9   : > { %s825_s15 = scalar_lea.sflag [#allocation3], %s824_s14 }
 0x2da   : > { %p1008_p2 = pnand %p1011_p1, %p1200_p6 }
 0x2dc   : > { %1096 = dma.done.wait (!%p1008_p2), %s825_s15, 2048  }
 0x2dd   : > { %1098 = vsyncadd (!%p1008_p2), %s825_s15, 4294965248  ;;  %p17_p3 = scmp.ge.s32.totalorder %s1183_s30, 4   ;;  %s1341_s24 = smov %s1105_s25 }
 0x2de   : > { %s1342_s25 = smov %s1109_s26  ;;  %s1343_s26 = smov %s1194_s10 }
 0x2df   : > { %s1344_s27 = smov %s1183_s30  ;;  %19 = sbr.rel (!%p17_p3) target bundleno = 3 (0x3), region = 83 }
 0x2e6   :  { %830 = vsyncpa [#allocation3], 1 }
 0x2e7   :  { %832 = vsyncpa [#allocation3 + $0x1], 1 }

</bundles_post_ra>
